<compile_context>
chip_gen: v7x
topology: tpu7x:2x2x1
jax: 0.10.0
libtpu: 0.0.40
codegen_flags: <defaults>
</compile_context>

<pallas_src>
import math

import jax
import jax.numpy as jnp
from jax.experimental import pallas as pl
from jax.experimental.pallas import tpu as pltpu


def _round_up(x, m):
    return (x + m - 1) // m * m


def _mlp_value_kernel(x_ref, w1_ref, b1_ref, w2_ref, b2_ref, w3_ref, b3_ref,
                      o_ref):
    # Layer 1: (TILE_B, obs_dim) @ (obs_dim, 256) on the MXU, f32 accumulation.
    h1 = jnp.dot(x_ref[...], w1_ref[...], preferred_element_type=jnp.float32)
    h1 = jnp.maximum(h1 + b1_ref[...], 0.0)
    # Layer 2: (TILE_B, 256) @ (256, 256) on the MXU, f32 accumulation.
    h2 = jnp.dot(h1.astype(w2_ref.dtype), w2_ref[...],
                 preferred_element_type=jnp.float32)
    h2 = jnp.maximum(h2 + b2_ref[...], 0.0)
    # Head (256 -> 1): VPU elementwise multiply + XLU cross-lane reduce.
    # Avoids a padded N=1 MXU matmul that would cost as much as layer 2.
    v = jnp.sum(h2 * w3_ref[...], axis=-1, keepdims=True)
    o_ref[...] = (v + b3_ref[...]).astype(o_ref.dtype)


def fully_connected_value_function(observations, params, *, tile_b=1024,
                                   use_bf16=False, vmem_limit_bytes=None):
    """observations: (B, obs_dim) f32 -> returns (B,) f32 values."""
    w1, b1, w2, b2, w3, b3 = params
    B, obs_dim = observations.shape
    H1 = w1.shape[1]
    H2 = w2.shape[1]

    # Clamp the batch tile for small B and zero-pad ragged batches.
    tile_b = max(8, min(tile_b, _round_up(B, 128)))
    b_pad = _round_up(B, tile_b)
    obs = observations.astype(jnp.float32)
    if b_pad != B:
        obs = jnp.pad(obs, ((0, b_pad - B), (0, 0)))

    if use_bf16:
        # bf16 MXU inputs; accumulation stays f32 inside the kernel.
        obs = obs.astype(jnp.bfloat16)
        w1 = w1.astype(jnp.bfloat16)
        w2 = w2.astype(jnp.bfloat16)

    # Head weight as a lane-dense (1, H2) row for the VPU/XLU reduce.
    w3_row = jnp.reshape(w3, (1, H2)).astype(jnp.float32)

    num_tiles = b_pad // tile_b
    const = lambda i: (0, 0)  # weights/biases stay resident across all tiles

    itemsize = 2 if use_bf16 else 4
    flops = 2 * b_pad * (obs_dim * H1 + H1 * H2 + H2)
    bytes_accessed = (
        b_pad * obs_dim * itemsize             # obs in
        + b_pad * 4                            # values out
        + (obs_dim * H1 + H1 * H2) * itemsize  # W1, W2
        + (H1 + H2 + H2 + 1) * 4               # b1, b2, w3, b3
    )

    out = pl.pallas_call(
        _mlp_value_kernel,
        out_shape=jax.ShapeDtypeStruct((b_pad, 1), jnp.float32),
        grid=(num_tiles,),
        in_specs=[
            pl.BlockSpec((tile_b, obs_dim), lambda i: (i, 0)),  # obs (streamed)
            pl.BlockSpec((obs_dim, H1), const),                 # W1 (resident)
            pl.BlockSpec((1, H1), const),                       # b1
            pl.BlockSpec((H1, H2), const),                      # W2 (resident)
            pl.BlockSpec((1, H2), const),                       # b2
            pl.BlockSpec((1, H2), const),                       # w3 row
            pl.BlockSpec((1, 1), const),                        # b3
        ],
        out_specs=pl.BlockSpec((tile_b, 1), lambda i: (i, 0)),
        compiler_params=pltpu.CompilerParams(
            dimension_semantics=("parallel",),
            vmem_limit_bytes=vmem_limit_bytes,
        ),
        cost_estimate=pl.CostEstimate(
            flops=flops, transcendentals=0, bytes_accessed=bytes_accessed),
    )(obs, w1, b1, w2, b2, w3_row, b3)

    # torch.squeeze(..., dim=-1) after dropping the padded rows.
    return jnp.squeeze(out[:B], axis=-1)


def init_params(key, observation_dim, arch='256-256'):
    """Deterministic init matching torch.nn.Linear default U[-1/sqrt(fan_in), +]."""
    hidden_sizes = [int(h) for h in arch.split('-')]
    dims = [observation_dim] + hidden_sizes + [1]
    params = []
    for i in range(len(dims) - 1):
        d_in, d_out = dims[i], dims[i + 1]
        key, kw, kb = jax.random.split(key, 3)
        bound = 1.0 / math.sqrt(d_in)
        # stored as (in, out) — transposed w.r.t. torch's (out, in)
        w = jax.random.uniform(kw, (d_in, d_out), jnp.float32, -bound, bound)
        b = jax.random.uniform(kb, (1, d_out), jnp.float32, -bound, bound)
        params.extend([w, b])
    return tuple(params)


def reference_forward(observations, params):
    w1, b1, w2, b2, w3, b3 = params
    hp = jax.lax.Precision.HIGHEST
    h1 = jnp.maximum(jnp.dot(observations, w1, precision=hp) + b1, 0.0)
    h2 = jnp.maximum(jnp.dot(h1, w2, precision=hp) + b2, 0.0)
    return jnp.squeeze(jnp.dot(h2, w3, precision=hp) + b3, axis=-1)


if __name__ == "__main__":
    key = jax.random.PRNGKey(0)
    key_obs, key_obs2, key_params = jax.random.split(key, 3)

    observation_dim = 16
    params = init_params(key_params, observation_dim, arch='256-256')

    # Small batch (single clamped tile with padding).
    obs_small = jax.random.normal(key_obs, (4, observation_dim), jnp.float32)
    vals = jax.block_until_ready(
        fully_connected_value_function(obs_small, params))
    ref = reference_forward(obs_small, params)
    assert vals.shape == (4,), vals.shape
    assert jnp.allclose(vals, ref, atol=1e-5, rtol=1e-5), (vals, ref)

    # Larger ragged batch: multiple grid tiles, resident weights, padded tail.
    obs_big = jax.random.normal(key_obs2, (300, observation_dim), jnp.float32)
    vals_big = jax.block_until_ready(
        fully_connected_value_function(obs_big, params, tile_b=128))
    ref_big = reference_forward(obs_big, params)
    assert vals_big.shape == (300,), vals_big.shape
    assert jnp.allclose(vals_big, ref_big, atol=1e-5, rtol=1e-5)

    # bf16 MXU-input path (f32 accumulation): looser tolerance.
    vals_bf16 = jax.block_until_ready(
        fully_connected_value_function(obs_big, params, tile_b=128,
                                       use_bf16=True))
    assert vals_bf16.shape == (300,), vals_bf16.shape
    assert jnp.allclose(vals_bf16, ref_big, atol=5e-2, rtol=5e-2)

    print("KERNEL_OK")
</pallas_src>

<mosaic_0001>
module attributes {stable_mosaic.version = 11 : i64} {
  func.func @_mlp_value_kernel(%arg0: i32, %arg1: memref<128x16xf32, #tpu.memory_space<vmem>>, %arg2: memref<16x256xf32, #tpu.memory_space<vmem>>, %arg3: memref<1x256xf32, #tpu.memory_space<vmem>>, %arg4: memref<256x256xf32, #tpu.memory_space<vmem>>, %arg5: memref<1x256xf32, #tpu.memory_space<vmem>>, %arg6: memref<1x256xf32, #tpu.memory_space<vmem>>, %arg7: memref<1x1xf32, #tpu.memory_space<vmem>>, %arg8: memref<128x1xf32, #tpu.memory_space<vmem>>) attributes {dimension_semantics = [#tpu.dimension_semantics<parallel>], iteration_bounds = array<i64: 1>, scalar_prefetch = 0 : i64, scratch_operands = 0 : i64, tpu.core_type = #tpu.core_type<tc>, window_params = [{transform_indices = @transform_0, window_bounds = array<i64: 128, 16>}, {pipeline_mode = #tpu.pipeline_mode<synchronous>, transform_indices = @transform_1, window_bounds = array<i64: 16, 256>}, {pipeline_mode = #tpu.pipeline_mode<synchronous>, transform_indices = @transform_2, window_bounds = array<i64: 1, 256>}, {pipeline_mode = #tpu.pipeline_mode<synchronous>, transform_indices = @transform_3, window_bounds = array<i64: 256, 256>}, {pipeline_mode = #tpu.pipeline_mode<synchronous>, transform_indices = @transform_4, window_bounds = array<i64: 1, 256>}, {pipeline_mode = #tpu.pipeline_mode<synchronous>, transform_indices = @transform_5, window_bounds = array<i64: 1, 256>}, {pipeline_mode = #tpu.pipeline_mode<synchronous>, transform_indices = @transform_6, window_bounds = array<i64: 1, 1>}, {transform_indices = @transform_7, window_bounds = array<i64: 128, 1>}]} {
    %c0 = arith.constant 0 : index
    %c0_0 = arith.constant 0 : index
    %0 = vector.load %arg1[%c0, %c0_0] : memref<128x16xf32, #tpu.memory_space<vmem>>, vector<128x16xf32>
    %c0_1 = arith.constant 0 : index
    %c0_2 = arith.constant 0 : index
    %1 = vector.load %arg2[%c0_1, %c0_2] : memref<16x256xf32, #tpu.memory_space<vmem>>, vector<16x256xf32>
    %cst = arith.constant dense<0.000000e+00> : vector<128x256xf32>
    %2 = tpu.matmul %0, %1, %cst {dimension_numbers = #tpu.dot_dimension_numbers<[1], [0], [0], [1], [0, 0, 1, 1], [], []>} : vector<128x16xf32>, vector<16x256xf32>, vector<128x256xf32> -> vector<128x256xf32>
    %c0_3 = arith.constant 0 : index
    %c0_4 = arith.constant 0 : index
    %3 = vector.load %arg3[%c0_3, %c0_4] : memref<1x256xf32, #tpu.memory_space<vmem>>, vector<1x256xf32>
    %4 = vector.broadcast %3 : vector<1x256xf32> to vector<128x256xf32>
    %5 = arith.addf %2, %4 : vector<128x256xf32>
    %cst_5 = arith.constant 0.000000e+00 : f32
    %6 = vector.broadcast %cst_5 : f32 to vector<128x256xf32>
    %7 = arith.maximumf %5, %6 : vector<128x256xf32>
    %c0_6 = arith.constant 0 : index
    %c0_7 = arith.constant 0 : index
    %8 = vector.load %arg4[%c0_6, %c0_7] : memref<256x256xf32, #tpu.memory_space<vmem>>, vector<256x256xf32>
    %cst_8 = arith.constant dense<0.000000e+00> : vector<128x256xf32>
    %9 = tpu.matmul %7, %8, %cst_8 {dimension_numbers = #tpu.dot_dimension_numbers<[1], [0], [0], [1], [0, 0, 1, 1], [], []>} : vector<128x256xf32>, vector<256x256xf32>, vector<128x256xf32> -> vector<128x256xf32>
    %c0_9 = arith.constant 0 : index
    %c0_10 = arith.constant 0 : index
    %10 = vector.load %arg5[%c0_9, %c0_10] : memref<1x256xf32, #tpu.memory_space<vmem>>, vector<1x256xf32>
    %11 = vector.broadcast %10 : vector<1x256xf32> to vector<128x256xf32>
    %12 = arith.addf %9, %11 : vector<128x256xf32>
    %cst_11 = arith.constant 0.000000e+00 : f32
    %13 = vector.broadcast %cst_11 : f32 to vector<128x256xf32>
    %14 = arith.maximumf %12, %13 : vector<128x256xf32>
    %c0_12 = arith.constant 0 : index
    %c0_13 = arith.constant 0 : index
    %15 = vector.load %arg6[%c0_12, %c0_13] : memref<1x256xf32, #tpu.memory_space<vmem>>, vector<1x256xf32>
    %16 = vector.broadcast %15 : vector<1x256xf32> to vector<128x256xf32>
    %17 = arith.mulf %14, %16 : vector<128x256xf32>
    %cst_14 = arith.constant dense<0.000000e+00> : vector<128xf32>
    %18 = vector.multi_reduction <add>, %17, %cst_14 [1] : vector<128x256xf32> to vector<128xf32>
    %19 = vector.shape_cast %18 : vector<128xf32> to vector<128x1xf32>
    %c0_15 = arith.constant 0 : index
    %c0_16 = arith.constant 0 : index
    %20 = vector.load %arg7[%c0_15, %c0_16] : memref<1x1xf32, #tpu.memory_space<vmem>>, vector<1x1xf32>
    %21 = vector.broadcast %20 : vector<1x1xf32> to vector<128x1xf32>
    %22 = arith.addf %19, %21 : vector<128x1xf32>
    %c0_17 = arith.constant 0 : index
    %c0_18 = arith.constant 0 : index
    %23 = vector.load %arg8[%c0_17, %c0_18] : memref<128x1xf32, #tpu.memory_space<vmem>>, vector<128x1xf32>
    tpu.vector_store %arg8[%c0_17, %c0_18], %22 {strides = array<i32>} : memref<128x1xf32, #tpu.memory_space<vmem>>, vector<128x1xf32>,
    return
  }
  func.func @transform_0(%arg0: i32) -> (i32, i32) {
    %c0_i32 = arith.constant 0 : i32
    %c0_i32_0 = arith.constant 0 : i32
    return %arg0, %c0_i32 : i32, i32
  }
  func.func @transform_1(%arg0: i32) -> (i32, i32) {
    %c0_i32 = arith.constant 0 : i32
    %c0_i32_0 = arith.constant 0 : i32
    %c0_i32_1 = arith.constant 0 : i32
    return %c0_i32, %c0_i32_0 : i32, i32
  }
  func.func @transform_2(%arg0: i32) -> (i32, i32) {
    %c0_i32 = arith.constant 0 : i32
    %c0_i32_0 = arith.constant 0 : i32
    %c0_i32_1 = arith.constant 0 : i32
    return %c0_i32, %c0_i32_0 : i32, i32
  }
  func.func @transform_3(%arg0: i32) -> (i32, i32) {
    %c0_i32 = arith.constant 0 : i32
    %c0_i32_0 = arith.constant 0 : i32
    %c0_i32_1 = arith.constant 0 : i32
    return %c0_i32, %c0_i32_0 : i32, i32
  }
  func.func @transform_4(%arg0: i32) -> (i32, i32) {
    %c0_i32 = arith.constant 0 : i32
    %c0_i32_0 = arith.constant 0 : i32
    %c0_i32_1 = arith.constant 0 : i32
    return %c0_i32, %c0_i32_0 : i32, i32
  }
  func.func @transform_5(%arg0: i32) -> (i32, i32) {
    %c0_i32 = arith.constant 0 : i32
    %c0_i32_0 = arith.constant 0 : i32
    %c0_i32_1 = arith.constant 0 : i32
    return %c0_i32, %c0_i32_0 : i32, i32
  }
  func.func @transform_6(%arg0: i32) -> (i32, i32) {
    %c0_i32 = arith.constant 0 : i32
    %c0_i32_0 = arith.constant 0 : i32
    %c0_i32_1 = arith.constant 0 : i32
    return %c0_i32, %c0_i32_0 : i32, i32
  }
  func.func @transform_7(%arg0: i32) -> (i32, i32) {
    %c0_i32 = arith.constant 0 : i32
    %c0_i32_0 = arith.constant 0 : i32
    return %arg0, %c0_i32 : i32, i32
  }
}

</mosaic_0001>

<bundles_post_ra>
// kernel: tpu_custom_call.1
= control target key start
LH: loop header
LB: loop body
LE: loop exit
PB: predicated region body
PF: predicated region fallthrough
CT: control target
= control target key end

     0   :  { %s1209_s0 = inlined_call_operand.vmem [shape: f32[128,16], index: 0, kind: input, shape index: {}]   ;;  %s1210_s1 = inlined_call_operand.vmem [shape: f32[16,256], index: 1, kind: input, shape index: {}]   ;;  %s1211_s2 = inlined_call_operand.vmem [shape: f32[1,256], index: 2, kind: input, shape index: {}]   ;;  %s1212_s3 = inlined_call_operand.hbm [shape: f32[256,256], index: 3, kind: input, shape index: {}]   ;;  %s1213_s4 = inlined_call_operand.vmem [shape: f32[1,256], index: 4, kind: input, shape index: {}]   ;;  %s1214_s5 = inlined_call_operand.vmem [shape: f32[1,256], index: 5, kind: input, shape index: {}]   ;;  %s1215_s6 = inlined_call_operand.<no memory space> [shape: f32[1,1], index: 6, kind: input, shape index: {}]   ;;  %s1216_s7 = inlined_call_operand.vmem [shape: f32[128,1], index: 7, kind: output, shape index: {}]  }
   0x1   :  { %v12_v0 = vstv %s1215_s6 }
   0x2   :  { %13 = vst [vmem:[#allocation2] sm:$0x1] %v12_v0 }
   0x3   :  { %14 = vsyncpa [#allocation4], 0  ;;  %s867_s26 = smov [#allocation3]   ;;  %s843_s30 = scalar_lea.hbm %s1212_s3, 8192 }
   0x4   :  { %s26_s27 = sshll.u32 %s867_s26, 4  ;;  %p844_p0 = scmp.ne.s32.totalorder %s1212_s3, %s843_s30  ;;  %s27_s27 = int_to_ptr.vmem [resolvable:$true] %s26_s27 }
   0x5   :  { %p847_p1 = scmp.lt.u32.totalorder %s843_s30, %s1212_s3 }
   0x7   :  { %p849_p2 = pnand %p847_p1, %p844_p0 }
   0x9   :  { %852 = shalt.err (!%p849_p2)
}
   0xa   :  { %s853_s6 = scalar_lea.vmem %s27_s27, 8192  ;;  %p858_p4 = scmp.lt.s32.totalorder %s27_s27, %s27_s27 }
   0xb   :  { %p854_p3 = scmp.ne.s32.totalorder %s27_s27, %s853_s6  ;;  %p859_p5 = scmp.lt.s32.totalorder %s853_s6, %s853_s6 }
   0xd   :  { %p860_p6 = por %p859_p5, %p858_p4 }
   0xf   :  { %p861_p7 = pnand %p860_p6, %p854_p3 }
  0x11   :  { %864 = shalt.err (!%p861_p7)
}
  0x12   :  { %s868_s12 = smov 256   ;;  %s869_s13 = smov 16  }
  0x13   :  { %32 = dma.hbm_to_vmem [thread:$0]  %s1212_s3, 8192, %s27_s27, [#allocation4], %s868_s12, %s868_s12, %s869_s13  }
  0x14   :  { %865 = dma.done.wait [#allocation4], 8192  }
  0x15   :  { %866 = vsyncadd [#allocation4], 4294959104  ;;  %v870_v1 = vmov 0.0   ;;  %v59_v2 = vld [vmem:[%s1210_s1 + $0x8] sm:$0xff]  ;;  %v61_v3 = vld [vmem:[%s1210_s1 + $0x18] sm:$0xff]  ;;  %vm74_vm0 = vcmask 130048  }
  0x16   :  { %187 = vmatprep.mubr.f32.mxu0 %v870_v1  ;;  %v58_v4 = vld [vmem:[%s1210_s1] sm:$0xff]  ;;  %v739_v5 = vpack.c.bf16 %v61_v3, %v59_v2  ;;  %v60_v6 = vld [vmem:[%s1210_s1 + $0x10] sm:$0xff]  ;;  %v43_v13 = vld [vmem:[%s1209_s0 + $0x8] sm:$0xff]  ;;  %vm700_vm1 = vcmask 7168  }
  0x17   :  { %v741_v7 = vpack.c.bf16 %v60_v6, %v58_v4  ;;  %v42_v8 = vld [vmem:[%s1209_s0] sm:$0xff]  ;;  %v317_v9 = vld [vmem:[#allocation3 + $0x8] sm:$0xff]  ;;  %v318_v12 = vld [vmem:[#allocation3 + $0x10] sm:$0xff] }
  0x18   :  { %740 = vmatprep.subr.bf16.mxu0 %v739_v5  ;;  %v319_v10 = vld [vmem:[#allocation3 + $0x18] sm:$0xff]  ;;  %v316_v11 = vld [vmem:[#allocation3] sm:$0xff]  ;;  %v321_v16 = vld [vmem:[#allocation3 + $0x28] sm:$0xff] }
  0x19   :  { %742 = vmatpush1.bf16.msra.mxu0 %v741_v7  ;;  %v743_v14 = vpack.c.bf16 %v319_v10, %v317_v9  ;;  %v745_v15 = vpack.c.bf16 %v318_v12, %v316_v11  ;;  %v323_v17 = vld [vmem:[#allocation3 + $0x38] sm:$0xff]  ;;  %v320_v19 = vld [vmem:[#allocation3 + $0x20] sm:$0xff]  ;;  %v322_v20 = vld [vmem:[#allocation3 + $0x30] sm:$0xff] }
  0x1a   :  { %v747_v18 = vpack.c.bf16 %v323_v17, %v321_v16  ;;  %v325_v21 = vld [vmem:[#allocation3 + $0x48] sm:$0xff]  ;;  %v327_v22 = vld [vmem:[#allocation3 + $0x58] sm:$0xff]  ;;  %v749_v24 = vpack.c.bf16 %v322_v20, %v320_v19  ;;  %v324_v26 = vld [vmem:[#allocation3 + $0x40] sm:$0xff] }
  0x1b   :  { %744 = vmatprep.subr.bf16.mxu0 %v743_v14  ;;  %807 = vmatprep.subr.bf16.mxu1 %v743_v14  ;;  %v44_v23 = vld [vmem:[%s1209_s0 + $0x10] sm:$0xff]  ;;  %v751_v25 = vpack.c.bf16 %v327_v22, %v325_v21  ;;  %v331_v29 = vld [vmem:[#allocation3 + $0x78] sm:$0xff]  ;;  %v328_v33 = vld [vmem:[#allocation3 + $0x60] sm:$0xff] }
  0x1c   :  { %722 = vmatmul.mubr.msk.f32.vlgmr.msra.gmra.mrb[0].mxu0 %vm74_vm0, %v42_v8  ;;  %823 = vmatpush1.bf16.msra.mxu1 %v745_v15  ;;  %v326_v27 = vld [vmem:[#allocation3 + $0x50] sm:$0xff]  ;;  %v329_v28 = vld [vmem:[#allocation3 + $0x68] sm:$0xff]  ;;  %v335_v36 = vld [vmem:[#allocation3 + $0x98] sm:$0xff] }
  0x1d   :  { %193 = vmatprep.mubr.f32.mxu0 %v870_v1  ;;  %746 = vmatpush1.bf16.msra.mxu0 %v745_v15  ;;  %v45_v30 = vld [vmem:[%s1209_s0 + $0x18] sm:$0xff]  ;;  %v753_v31 = vpack.c.bf16 %v326_v27, %v324_v26  ;;  %v755_v32 = vpack.c.bf16 %v331_v29, %v329_v28  ;;  %v333_v35 = vld [vmem:[#allocation3 + $0x88] sm:$0xff]  ;;  %v46_v37 = vld [vmem:[%s1209_s0 + $0x20] sm:$0xff] }
  0x1e   :  { %748 = vmatprep.subr.bf16.mxu0 %v747_v18  ;;  %808 = vmatprep.subr.bf16.mxu1 %v747_v18  ;;  %v330_v34 = vld [vmem:[#allocation3 + $0x70] sm:$0xff]  ;;  %v759_v39 = vpack.c.bf16 %v335_v36, %v333_v35  ;;  %v332_v40 = vld [vmem:[#allocation3 + $0x80] sm:$0xff]  ;;  %v337_v42 = vld [vmem:[#allocation3 + $0xa8] sm:$0xff] }
  0x1f   :  { %v757_v38 = vpack.c.bf16 %v330_v34, %v328_v33  ;;  %v334_v41 = vld [vmem:[#allocation3 + $0x90] sm:$0xff]  ;;  %v339_v43 = vld [vmem:[#allocation3 + $0xb8] sm:$0xff]  ;;  %v47_v44 = vld [vmem:[%s1209_s0 + $0x28] sm:$0xff] }
  0x20   :  { %723 = vmatmul.mubr.msk.f32.gmra.mrb[2].mxu0 %vm74_vm0, %v43_v13  ;;  %824 = vmatpush1.bf16.msra.mxu1 %v749_v24  ;;  %v761_v45 = vpack.c.bf16 %v334_v41, %v332_v40  ;;  %v763_v46 = vpack.c.bf16 %v339_v43, %v337_v42  ;;  %v336_v47 = vld [vmem:[#allocation3 + $0xa0] sm:$0xff]  ;;  %v338_v48 = vld [vmem:[#allocation3 + $0xb0] sm:$0xff]  ;;  %v341_v49 = vld [vmem:[#allocation3 + $0xc8] sm:$0xff] }
  0x21   :  { %199 = vmatprep.mubr.f32.mxu0 %v870_v1  ;;  %750 = vmatpush1.bf16.msra.mxu0 %v749_v24  ;;  %v343_v50 = vld [vmem:[#allocation3 + $0xd8] sm:$0xff]  ;;  %v48_v51 = vld [vmem:[%s1209_s0 + $0x30] sm:$0xff]  ;;  %v765_v52 = vpack.c.bf16 %v338_v48, %v336_v47  ;;  %v340_v54 = vld [vmem:[#allocation3 + $0xc0] sm:$0xff] }
  0x22   :  { %752 = vmatprep.subr.bf16.mxu0 %v751_v25  ;;  %809 = vmatprep.subr.bf16.mxu1 %v751_v25  ;;  %v767_v53 = vpack.c.bf16 %v343_v50, %v341_v49  ;;  %v342_v55 = vld [vmem:[#allocation3 + $0xd0] sm:$0xff]  ;;  %v345_v56 = vld [vmem:[#allocation3 + $0xe8] sm:$0xff]  ;;  %v347_v57 = vld [vmem:[#allocation3 + $0xf8] sm:$0xff] }
  0x23   :  { %v49_v58 = vld [vmem:[%s1209_s0 + $0x38] sm:$0xff]  ;;  %v769_v59 = vpack.c.bf16 %v342_v55, %v340_v54  ;;  %v771_v60 = vpack.c.bf16 %v347_v57, %v345_v56  ;;  %v344_v61 = vld [vmem:[#allocation3 + $0xe0] sm:$0xff]  ;;  %v349_v63 = vld [vmem:[#allocation3 + $0x108] sm:$0xff]  ;;  %v64_v56 = vlaneseq }
  0x24   :  { %724 = vmatmul.mubr.msk.f32.gmra.mrb[4].mxu0 %vm74_vm0, %v44_v23  ;;  %825 = vmatpush1.bf16.msra.mxu1 %v753_v31  ;;  %v346_v62 = vld [vmem:[#allocation3 + $0xf0] sm:$0xff]  ;;  %v351_v0 = vld [vmem:[#allocation3 + $0x118] sm:$0xff]  ;;  %v348_v5 = vld [vmem:[#allocation3 + $0x100] sm:$0xff] }
  0x25   :  { %205 = vmatprep.mubr.f32.mxu0 %v870_v1  ;;  %754 = vmatpush1.bf16.msra.mxu0 %v753_v31  ;;  %v50_v2 = vld [vmem:[%s1209_s0 + $0x40] sm:$0xff]  ;;  %v773_v3 = vpack.c.bf16 %v346_v62, %v344_v61  ;;  %v775_v4 = vpack.c.bf16 %v351_v0, %v349_v63  ;;  %v350_v6 = vld [vmem:[#allocation3 + $0x110] sm:$0xff]  ;;  %v353_v7 = vld [vmem:[#allocation3 + $0x128] sm:$0xff]  ;;  %v65_v57 = vshrl.u32 %v64_v56, 7 }
  0x26   :  { %756 = vmatprep.subr.bf16.mxu0 %v755_v32  ;;  %810 = vmatprep.subr.bf16.mxu1 %v755_v32  ;;  %v355_v8 = vld [vmem:[#allocation3 + $0x138] sm:$0xff]  ;;  %v51_v9 = vld [vmem:[%s1209_s0 + $0x48] sm:$0xff]  ;;  %v777_v10 = vpack.c.bf16 %v350_v6, %v348_v5  ;;  %v354_v13 = vld [vmem:[#allocation3 + $0x130] sm:$0xff] }
  0x27   :  { %v779_v11 = vpack.c.bf16 %v355_v8, %v353_v7  ;;  %v352_v12 = vld [vmem:[#allocation3 + $0x120] sm:$0xff]  ;;  %v357_v14 = vld [vmem:[#allocation3 + $0x148] sm:$0xff]  ;;  %v359_v15 = vld [vmem:[#allocation3 + $0x158] sm:$0xff] }
  0x28   :  { %725 = vmatmul.mubr.msk.f32.gmra.mrb[6].mxu0 %vm74_vm0, %v45_v30  ;;  %826 = vmatpush1.bf16.msra.mxu1 %v757_v38  ;;  %v52_v16 = vld [vmem:[%s1209_s0 + $0x50] sm:$0xff]  ;;  %v781_v17 = vpack.c.bf16 %v354_v13, %v352_v12  ;;  %v783_v18 = vpack.c.bf16 %v359_v15, %v357_v14  ;;  %v356_v19 = vld [vmem:[#allocation3 + $0x140] sm:$0xff]  ;;  %v363_v22 = vld [vmem:[#allocation3 + $0x178] sm:$0xff] }
  0x29   :  { %211 = vmatprep.mubr.f32.mxu0 %v870_v1  ;;  %758 = vmatpush1.bf16.msra.mxu0 %v757_v38  ;;  %v358_v20 = vld [vmem:[#allocation3 + $0x150] sm:$0xff]  ;;  %v361_v21 = vld [vmem:[#allocation3 + $0x168] sm:$0xff]  ;;  %v360_v26 = vld [vmem:[#allocation3 + $0x160] sm:$0xff] }
  0x2a   :  { %760 = vmatprep.subr.bf16.mxu0 %v759_v39  ;;  %811 = vmatprep.subr.bf16.mxu1 %v759_v39  ;;  %v53_v23 = vld [vmem:[%s1209_s0 + $0x58] sm:$0xff]  ;;  %v785_v24 = vpack.c.bf16 %v358_v20, %v356_v19  ;;  %v787_v25 = vpack.c.bf16 %v363_v22, %v361_v21  ;;  %v365_v28 = vld [vmem:[#allocation3 + $0x188] sm:$0xff]  ;;  %v54_v30 = vld [vmem:[%s1209_s0 + $0x60] sm:$0xff] }
  0x2b   :  { %v362_v27 = vld [vmem:[#allocation3 + $0x170] sm:$0xff]  ;;  %v367_v29 = vld [vmem:[#allocation3 + $0x198] sm:$0xff]  ;;  %v364_v33 = vld [vmem:[#allocation3 + $0x180] sm:$0xff] }
  0x2c   :  { %726 = vmatmul.mubr.msk.f32.gmra.mrb[8].mxu0 %vm74_vm0, %v46_v37  ;;  %827 = vmatpush1.bf16.msra.mxu1 %v761_v45  ;;  %v789_v31 = vpack.c.bf16 %v362_v27, %v360_v26  ;;  %v791_v32 = vpack.c.bf16 %v367_v29, %v365_v28  ;;  %v366_v34 = vld [vmem:[#allocation3 + $0x190] sm:$0xff]  ;;  %v369_v35 = vld [vmem:[#allocation3 + $0x1a8] sm:$0xff]  ;;  %v371_v36 = vld [vmem:[#allocation3 + $0x1b8] sm:$0xff] }
  0x2d   :  { %217 = vmatprep.mubr.f32.mxu0 %v870_v1  ;;  %762 = vmatpush1.bf16.msra.mxu0 %v761_v45  ;;  %v55_v37 = vld [vmem:[%s1209_s0 + $0x68] sm:$0xff]  ;;  %v793_v38 = vpack.c.bf16 %v366_v34, %v364_v33  ;;  %v795_v39 = vpack.c.bf16 %v371_v36, %v369_v35  ;;  %v370_v41 = vld [vmem:[#allocation3 + $0x1b0] sm:$0xff]  ;;  %v375_v43 = vld [vmem:[#allocation3 + $0x1d8] sm:$0xff] }
  0x2e   :  { %764 = vmatprep.subr.bf16.mxu0 %v763_v46  ;;  %812 = vmatprep.subr.bf16.mxu1 %v763_v46  ;;  %v368_v40 = vld [vmem:[#allocation3 + $0x1a0] sm:$0xff]  ;;  %v373_v42 = vld [vmem:[#allocation3 + $0x1c8] sm:$0xff]  ;;  %v57_v47 = vld [vmem:[%s1209_s0 + $0x78] sm:$0xff] }
  0x2f   :  { %v797_v45 = vpack.c.bf16 %v370_v41, %v368_v40  ;;  %v799_v46 = vpack.c.bf16 %v375_v43, %v373_v42  ;;  %v372_v48 = vld [vmem:[#allocation3 + $0x1c0] sm:$0xff]  ;;  %v374_v49 = vld [vmem:[#allocation3 + $0x1d0] sm:$0xff] }
  0x30   :  { %727 = vmatmul.mubr.msk.f32.gmra.mrb[10].mxu0 %vm74_vm0, %v47_v44  ;;  %828 = vmatpush1.bf16.msra.mxu1 %v765_v52  ;;  %v56_v44 = vld [vmem:[%s1209_s0 + $0x70] sm:$0xff]  ;;  %v801_v50 = vpack.c.bf16 %v374_v49, %v372_v48  ;;  %v376_v54 = vld [vmem:[#allocation3 + $0x1e0] sm:$0xff] }
  0x31   :  { %223 = vmatprep.mubr.f32.mxu0 %v870_v1  ;;  %766 = vmatpush1.bf16.msra.mxu0 %v765_v52  ;;  %v379_v52 = vld [vmem:[#allocation3 + $0x1f8] sm:$0xff]  ;;  %v378_v55 = vld [vmem:[#allocation3 + $0x1f0] sm:$0xff] }
  0x32   :  { %768 = vmatprep.subr.bf16.mxu0 %v767_v53  ;;  %813 = vmatprep.subr.bf16.mxu1 %v767_v53 }
  0x34   :  { %728 = vmatmul.mubr.msk.f32.gmra.mrb[12].mxu0 %vm74_vm0, %v48_v51  ;;  %829 = vmatpush1.bf16.msra.mxu1 %v769_v59  ;;  %v377_v51 = vld [vmem:[#allocation3 + $0x1e8] sm:$0xff] }
  0x35   :  { %229 = vmatprep.mubr.f32.mxu0 %v870_v1  ;;  %770 = vmatpush1.bf16.msra.mxu0 %v769_v59  ;;  %v803_v53 = vpack.c.bf16 %v379_v52, %v377_v51  ;;  %v62_v59 = vld [vmem:[%s1211_s2] sm:$0x3] }
  0x36   :  { %772 = vmatprep.subr.bf16.mxu0 %v771_v60  ;;  %814 = vmatprep.subr.bf16.mxu1 %v771_v60  ;;  %v1023_v60 = vsub.s32 1, %v65_v57 }
  0x38   :  { %729 = vmatmul.mubr.msk.f32.gmra.mrb[14].mxu0 %vm74_vm0, %v49_v58  ;;  %830 = vmatpush1.bf16.msra.mxu1 %v773_v3  ;;  %v1018_v58 = vsub.s32 0, %v65_v57  ;;  %v1029_v62 = vrot.slane %v62_v59, %v1023_v60 }
  0x39   :  { %235 = vmatprep.mubr.f32.mxu0 %v870_v1  ;;  %774 = vmatpush1.bf16.msra.mxu0 %v773_v3 }
  0x3a   :  { %776 = vmatprep.subr.bf16.mxu0 %v775_v4  ;;  %815 = vmatprep.subr.bf16.mxu1 %v775_v4  ;;  %v1026_v61 = vrot.slane %v62_v59, %v1018_v58 }
  0x3c   :  { %730 = vmatmul.mubr.msk.f32.gmra.mrb[16].mxu0 %vm74_vm0, %v50_v2  ;;  %831 = vmatpush1.bf16.msra.mxu1 %v777_v10 }
  0x3d   :  { %241 = vmatprep.mubr.f32.mxu0 %v870_v1  ;;  %778 = vmatpush1.bf16.msra.mxu0 %v777_v10 }
  0x3e   :  { %780 = vmatprep.subr.bf16.mxu0 %v779_v11  ;;  %816 = vmatprep.subr.bf16.mxu1 %v779_v11 }
  0x40   :  { %731 = vmatmul.mubr.msk.f32.gmra.mrb[18].mxu0 %vm74_vm0, %v51_v9  ;;  %832 = vmatpush1.bf16.msra.mxu1 %v781_v17 }
  0x41   :  { %247 = vmatprep.mubr.f32.mxu0 %v870_v1  ;;  %782 = vmatpush1.bf16.msra.mxu0 %v781_v17 }
  0x42   :  { %784 = vmatprep.subr.bf16.mxu0 %v783_v18  ;;  %817 = vmatprep.subr.bf16.mxu1 %v783_v18 }
  0x44   :  { %732 = vmatmul.mubr.msk.f32.gmra.mrb[20].mxu0 %vm74_vm0, %v52_v16  ;;  %833 = vmatpush1.bf16.msra.mxu1 %v785_v24 }
  0x45   :  { %253 = vmatprep.mubr.f32.mxu0 %v870_v1  ;;  %786 = vmatpush1.bf16.msra.mxu0 %v785_v24 }
  0x46   :  { %788 = vmatprep.subr.bf16.mxu0 %v787_v25  ;;  %818 = vmatprep.subr.bf16.mxu1 %v787_v25 }
  0x48   :  { %733 = vmatmul.mubr.msk.f32.gmra.mrb[22].mxu0 %vm74_vm0, %v53_v23  ;;  %834 = vmatpush1.bf16.msra.mxu1 %v789_v31 }
  0x49   :  { %259 = vmatprep.mubr.f32.mxu0 %v870_v1  ;;  %790 = vmatpush1.bf16.msra.mxu0 %v789_v31 }
  0x4a   :  { %792 = vmatprep.subr.bf16.mxu0 %v791_v32  ;;  %819 = vmatprep.subr.bf16.mxu1 %v791_v32 }
  0x4c   :  { %734 = vmatmul.mubr.msk.f32.gmra.mrb[24].mxu0 %vm74_vm0, %v54_v30  ;;  %835 = vmatpush1.bf16.msra.mxu1 %v793_v38 }
  0x4d   :  { %265 = vmatprep.mubr.f32.mxu0 %v870_v1  ;;  %794 = vmatpush1.bf16.msra.mxu0 %v793_v38 }
  0x4e   :  { %796 = vmatprep.subr.bf16.mxu0 %v795_v39  ;;  %820 = vmatprep.subr.bf16.mxu1 %v795_v39 }
  0x50   :  { %735 = vmatmul.mubr.msk.f32.gmra.mrb[26].mxu0 %vm74_vm0, %v55_v37  ;;  %836 = vmatpush1.bf16.msra.mxu1 %v797_v45 }
  0x51   :  { %271 = vmatprep.mubr.f32.mxu0 %v870_v1  ;;  %798 = vmatpush1.bf16.msra.mxu0 %v797_v45 }
  0x52   :  { %800 = vmatprep.subr.bf16.mxu0 %v799_v46  ;;  %821 = vmatprep.subr.bf16.mxu1 %v799_v46 }
  0x54   :  { %736 = vmatmul.mubr.msk.f32.gmra.mrb[28].mxu0 %vm74_vm0, %v56_v44  ;;  %837 = vmatpush1.bf16.msra.mxu1 %v801_v50 }
  0x55   :  { %277 = vmatprep.mubr.f32.mxu0 %v870_v1  ;;  %802 = vmatpush1.bf16.msra.mxu0 %v801_v50  ;;  %v805_v1 = vpack.c.bf16 %v378_v55, %v376_v54 }
  0x56   :  { %804 = vmatprep.subr.bf16.mxu0 %v803_v53  ;;  %822 = vmatprep.subr.bf16.mxu1 %v803_v53 }
  0x58   :  { %737 = vmatmul.mubr.msk.f32.gmra.mrb[30].mxu0 %vm74_vm0, %v57_v47  ;;  %838 = vmatpush1.bf16.msra.mxu1 %v805_v1 }
  0x59   :  { %806 = vmatpush1.bf16.msra.mxu0 %v805_v1 }
  0xef   :  { %v189_v63 = vpop.f32.mrb[0].mxu0 }
  0xf0   :  { %v190_v0 = vadd.f32 %v189_v63, %v1026_v61  ;;  %v191_v2 = vpop.f32.mrb[1].mxu0 }
  0xf1   :  { %v192_v3 = vadd.f32 %v191_v2, %v1029_v62 }
  0xf2   :  { %v284_v6 = vmax.f32 %v190_v0, 0.0 }
  0xf3   :  { %v285_v4 = vmax.f32 %v192_v3, 0.0  ;;  %v195_v5 = vpop.f32.mrb[2].mxu0 }
  0xf4   :  { %v196_v7 = vadd.f32 %v195_v5, %v1026_v61  ;;  %v197_v8 = vpop.f32.mrb[3].mxu0 }
  0xf5   :  { %v198_v9 = vadd.f32 %v197_v8, %v1029_v62  ;;  %456 = vmatprep.mubr.f32.mxu0 %v285_v4 }
  0xf6   :  { %457 = vmatmul.mubr.f32.vlgmr.msra.gmra.mrb[32].mxu0 %v284_v6  ;;  %v286_v12 = vmax.f32 %v196_v7, 0.0 }
  0xf7   :  { %v287_v10 = vmax.f32 %v198_v9, 0.0  ;;  %v201_v11 = vpop.f32.mrb[4].mxu0 }
  0xf8   :  { %v202_v13 = vadd.f32 %v201_v11, %v1026_v61  ;;  %v203_v14 = vpop.f32.mrb[5].mxu0 }
  0xf9   :  { %v204_v15 = vadd.f32 %v203_v14, %v1029_v62  ;;  %462 = vmatprep.mubr.f32.mxu0 %v287_v10 }
  0xfa   :  { %463 = vmatmul.mubr.f32.gmra.mrb[34].mxu0 %v286_v12  ;;  %v288_v18 = vmax.f32 %v202_v13, 0.0 }
  0xfb   :  { %v289_v16 = vmax.f32 %v204_v15, 0.0  ;;  %v207_v17 = vpop.f32.mrb[6].mxu0 }
  0xfc   :  { %v208_v19 = vadd.f32 %v207_v17, %v1026_v61  ;;  %v209_v20 = vpop.f32.mrb[7].mxu0 }
  0xfd   :  { %v210_v21 = vadd.f32 %v209_v20, %v1029_v62  ;;  %468 = vmatprep.mubr.f32.mxu0 %v289_v16 }
  0xfe   :  { %469 = vmatmul.mubr.f32.gmra.mrb[36].mxu0 %v288_v18  ;;  %v290_v24 = vmax.f32 %v208_v19, 0.0 }
  0xff   :  { %v291_v22 = vmax.f32 %v210_v21, 0.0  ;;  %v213_v23 = vpop.f32.mrb[8].mxu0 }
 0x100   :  { %v214_v25 = vadd.f32 %v213_v23, %v1026_v61  ;;  %v215_v26 = vpop.f32.mrb[9].mxu0 }
 0x101   :  { %v216_v27 = vadd.f32 %v215_v26, %v1029_v62  ;;  %474 = vmatprep.mubr.f32.mxu0 %v291_v22 }
 0x102   :  { %475 = vmatmul.mubr.f32.gmra.mrb[38].mxu0 %v290_v24  ;;  %v292_v30 = vmax.f32 %v214_v25, 0.0 }
 0x103   :  { %v293_v28 = vmax.f32 %v216_v27, 0.0  ;;  %v219_v29 = vpop.f32.mrb[10].mxu0 }
 0x104   :  { %v220_v31 = vadd.f32 %v219_v29, %v1026_v61  ;;  %v221_v32 = vpop.f32.mrb[11].mxu0 }
 0x105   :  { %v222_v33 = vadd.f32 %v221_v32, %v1029_v62  ;;  %480 = vmatprep.mubr.f32.mxu0 %v293_v28 }
 0x106   :  { %481 = vmatmul.mubr.f32.gmra.mrb[40].mxu0 %v292_v30  ;;  %v294_v36 = vmax.f32 %v220_v31, 0.0 }
 0x107   :  { %v295_v34 = vmax.f32 %v222_v33, 0.0  ;;  %v225_v35 = vpop.f32.mrb[12].mxu0 }
 0x108   :  { %v226_v37 = vadd.f32 %v225_v35, %v1026_v61  ;;  %v227_v38 = vpop.f32.mrb[13].mxu0 }
 0x109   :  { %v228_v39 = vadd.f32 %v227_v38, %v1029_v62  ;;  %486 = vmatprep.mubr.f32.mxu0 %v295_v34 }
 0x10a   :  { %487 = vmatmul.mubr.f32.gmra.mrb[42].mxu0 %v294_v36  ;;  %v296_v42 = vmax.f32 %v226_v37, 0.0  ;;  %v380_v36 = vld [vmem:[%s1213_s4] sm:$0x3] }
 0x10b   :  { %v297_v40 = vmax.f32 %v228_v39, 0.0  ;;  %v231_v41 = vpop.f32.mrb[14].mxu0  ;;  %v1067_v37 = vrot.slane %v380_v36, %v1018_v58  ;;  %v1070_v38 = vrot.slane %v380_v36, %v1023_v60 }
 0x10c   :  { %v232_v43 = vadd.f32 %v231_v41, %v1026_v61  ;;  %v233_v44 = vpop.f32.mrb[15].mxu0 }
 0x10d   :  { %492 = vmatprep.mubr.f32.mxu0 %v297_v40  ;;  %v234_v45 = vadd.f32 %v233_v44, %v1029_v62 }
 0x10e   :  { %493 = vmatmul.mubr.f32.gmra.mrb[44].mxu0 %v296_v42  ;;  %v298_v48 = vmax.f32 %v232_v43, 0.0 }
 0x10f   :  { %v237_v46 = vpop.f32.mrb[16].mxu0  ;;  %v299_v47 = vmax.f32 %v234_v45, 0.0 }
 0x110   :  { %v238_v49 = vadd.f32 %v237_v46, %v1026_v61  ;;  %v239_v50 = vpop.f32.mrb[17].mxu0 }
 0x111   :  { %v240_v51 = vadd.f32 %v239_v50, %v1029_v62  ;;  %498 = vmatprep.mubr.f32.mxu1 %v299_v47 }
 0x112   :  { %499 = vmatmul.mubr.f32.vlgmr.msra.gmra.mrb[0].mxu1 %v298_v48  ;;  %v300_v54 = vmax.f32 %v238_v49, 0.0 }
 0x113   :  { %v301_v52 = vmax.f32 %v240_v51, 0.0  ;;  %v243_v53 = vpop.f32.mrb[18].mxu0 }
 0x114   :  { %v244_v55 = vadd.f32 %v243_v53, %v1026_v61  ;;  %v245_v1 = vpop.f32.mrb[19].mxu0 }
 0x115   :  { %v246_v56 = vadd.f32 %v245_v1, %v1029_v62  ;;  %504 = vmatprep.mubr.f32.mxu1 %v301_v52 }
 0x116   :  { %505 = vmatmul.mubr.f32.gmra.mrb[2].mxu1 %v300_v54  ;;  %v302_v63 = vmax.f32 %v244_v55, 0.0 }
 0x117   :  { %v303_v57 = vmax.f32 %v246_v56, 0.0  ;;  %v249_v59 = vpop.f32.mrb[20].mxu0 }
 0x118   :  { %v250_v0 = vadd.f32 %v249_v59, %v1026_v61  ;;  %v251_v2 = vpop.f32.mrb[21].mxu0 }
 0x119   :  { %v252_v3 = vadd.f32 %v251_v2, %v1029_v62  ;;  %510 = vmatprep.mubr.f32.mxu1 %v303_v57 }
 0x11a   :  { %511 = vmatmul.mubr.f32.gmra.mrb[4].mxu1 %v302_v63  ;;  %v304_v6 = vmax.f32 %v250_v0, 0.0 }
 0x11b   :  { %v305_v4 = vmax.f32 %v252_v3, 0.0  ;;  %v255_v5 = vpop.f32.mrb[22].mxu0 }
 0x11c   :  { %v256_v7 = vadd.f32 %v255_v5, %v1026_v61  ;;  %v257_v8 = vpop.f32.mrb[23].mxu0 }
 0x11d   :  { %v258_v9 = vadd.f32 %v257_v8, %v1029_v62  ;;  %516 = vmatprep.mubr.f32.mxu1 %v305_v4 }
 0x11e   :  { %517 = vmatmul.mubr.f32.gmra.mrb[6].mxu1 %v304_v6  ;;  %v306_v12 = vmax.f32 %v256_v7, 0.0 }
 0x11f   :  { %v307_v10 = vmax.f32 %v258_v9, 0.0  ;;  %v261_v11 = vpop.f32.mrb[24].mxu0 }
 0x120   :  { %v262_v13 = vadd.f32 %v261_v11, %v1026_v61  ;;  %v263_v14 = vpop.f32.mrb[25].mxu0 }
 0x121   :  { %v264_v15 = vadd.f32 %v263_v14, %v1029_v62  ;;  %522 = vmatprep.mubr.f32.mxu1 %v307_v10 }
 0x122   :  { %523 = vmatmul.mubr.f32.gmra.mrb[8].mxu1 %v306_v12  ;;  %v308_v18 = vmax.f32 %v262_v13, 0.0 }
 0x123   :  { %v309_v16 = vmax.f32 %v264_v15, 0.0  ;;  %v267_v17 = vpop.f32.mrb[26].mxu0 }
 0x124   :  { %v268_v19 = vadd.f32 %v267_v17, %v1026_v61  ;;  %v269_v20 = vpop.f32.mrb[27].mxu0 }
 0x125   :  { %v270_v21 = vadd.f32 %v269_v20, %v1029_v62  ;;  %528 = vmatprep.mubr.f32.mxu1 %v309_v16 }
 0x126   :  { %529 = vmatmul.mubr.f32.gmra.mrb[10].mxu1 %v308_v18  ;;  %v310_v24 = vmax.f32 %v268_v19, 0.0 }
 0x127   :  { %v311_v22 = vmax.f32 %v270_v21, 0.0  ;;  %v273_v23 = vpop.f32.mrb[28].mxu0 }
 0x128   :  { %v274_v25 = vadd.f32 %v273_v23, %v1026_v61  ;;  %v275_v26 = vpop.f32.mrb[29].mxu0 }
 0x129   :  { %v276_v27 = vadd.f32 %v275_v26, %v1029_v62  ;;  %534 = vmatprep.mubr.f32.mxu1 %v311_v22 }
 0x12a   :  { %535 = vmatmul.mubr.f32.gmra.mrb[12].mxu1 %v310_v24  ;;  %v312_v30 = vmax.f32 %v274_v25, 0.0 }
 0x12b   :  { %v313_v28 = vmax.f32 %v276_v27, 0.0  ;;  %v279_v29 = vpop.f32.mrb[30].mxu0 }
 0x12c   :  { %v280_v31 = vadd.f32 %v279_v29, %v1026_v61  ;;  %v281_v32 = vpop.f32.mrb[31].mxu0  ;;  %v585_v61 = vld [vmem:[%s1214_s5] sm:$0x3] }
 0x12d   :  { %v282_v33 = vadd.f32 %v281_v32, %v1029_v62  ;;  %540 = vmatprep.mubr.f32.mxu1 %v313_v28  ;;  %v1077_v41 = vrot.slane %v585_v61, %v1018_v58  ;;  %v1081_v43 = vrot.slane %v585_v61, %v1023_v60 }
 0x12e   :  { %541 = vmatmul.mubr.f32.gmra.mrb[14].mxu1 %v312_v30  ;;  %v314_v35 = vmax.f32 %v280_v31, 0.0 }
 0x12f   :  { %v315_v34 = vmax.f32 %v282_v33, 0.0 }
 0x131   :  { %546 = vmatprep.mubr.f32.mxu1 %v315_v34 }
 0x132   :  { %547 = vmatmul.mubr.f32.gmra.mrb[16].mxu1 %v314_v35 }
 0x1c9   :  { %v458_v62 = vpop.f32.mrb[32].mxu0 }
 0x1ca   :  { %v459_v39 = vadd.f32 %v458_v62, %v1067_v37  ;;  %v460_v40 = vpop.f32.mrb[33].mxu0 }
 0x1cb   :  { %v461_v42 = vadd.f32 %v460_v40, %v1070_v38 }
 0x1cc   :  { %v553_v44 = vmax.f32 %v459_v39, 0.0 }
 0x1cd   :  { %v554_v45 = vmax.f32 %v461_v42, 0.0  ;;  %v464_v46 = vpop.f32.mrb[34].mxu0 }
 0x1ce   :  { %v465_v47 = vadd.f32 %v464_v46, %v1067_v37  ;;  %v466_v48 = vpop.f32.mrb[35].mxu0  ;;  %v597_v49 = vmul.f32 %v1077_v41, %v553_v44 }
 0x1cf   :  { %v467_v50 = vadd.f32 %v466_v48, %v1070_v38  ;;  %v598_v51 = vmul.f32 %v1081_v43, %v554_v45 }
 0x1d0   :  { %v555_v52 = vmax.f32 %v465_v47, 0.0 }
 0x1d1   :  { %v556_v58 = vmax.f32 %v467_v50, 0.0  ;;  %v470_v53 = vpop.f32.mrb[36].mxu0  ;;  %v629_v54 = vadd.f32 %v598_v51, %v597_v49 }
 0x1d2   :  { %v599_v55 = vmul.f32 %v1077_v41, %v555_v52  ;;  %v471_v60 = vadd.f32 %v470_v53, %v1067_v37  ;;  %v472_v1 = vpop.f32.mrb[37].mxu0 }
 0x1d3   :  { %v600_v56 = vmul.f32 %v1081_v43, %v556_v58  ;;  %v473_v57 = vadd.f32 %v472_v1, %v1070_v38  ;;  %630 = vadd.xlane.f32.xlu0 %v629_v54 }
 0x1d4   :  { %v557_v59 = vmax.f32 %v471_v60, 0.0 }
 0x1d5   :  { %v558_v63 = vmax.f32 %v473_v57, 0.0  ;;  %v476_v0 = vpop.f32.mrb[38].mxu0  ;;  %v632_v2 = vadd.f32 %v600_v56, %v599_v55 }
 0x1d6   :  { %v477_v3 = vadd.f32 %v476_v0, %v1067_v37  ;;  %v478_v4 = vpop.f32.mrb[39].mxu0  ;;  %v601_v5 = vmul.f32 %v1077_v41, %v557_v59 }
 0x1d7   :  { %v479_v6 = vadd.f32 %v478_v4, %v1070_v38  ;;  %633 = vadd.xlane.f32.xlu0 %v632_v2  ;;  %v602_v7 = vmul.f32 %v1081_v43, %v558_v63 }
 0x1d8   :  { %v559_v8 = vmax.f32 %v477_v3, 0.0 }
 0x1d9   :  { %v560_v9 = vmax.f32 %v479_v6, 0.0  ;;  %v482_v10 = vpop.f32.mrb[40].mxu0  ;;  %v635_v11 = vadd.f32 %v602_v7, %v601_v5 }
 0x1da   :  { %v603_v12 = vmul.f32 %v1077_v41, %v559_v8  ;;  %v483_v13 = vadd.f32 %v482_v10, %v1067_v37  ;;  %v484_v14 = vpop.f32.mrb[41].mxu0 }
 0x1db   :  { %v604_v15 = vmul.f32 %v1081_v43, %v560_v9  ;;  %v485_v16 = vadd.f32 %v484_v14, %v1070_v38  ;;  %636 = vadd.xlane.f32.xlu1 %v635_v11 }
 0x1dc   :  { %v561_v17 = vmax.f32 %v483_v13, 0.0 }
 0x1dd   :  { %v562_v18 = vmax.f32 %v485_v16, 0.0  ;;  %v488_v19 = vpop.f32.mrb[42].mxu0  ;;  %v638_v20 = vadd.f32 %v604_v15, %v603_v12 }
 0x1de   :  { %v605_v21 = vmul.f32 %v1077_v41, %v561_v17  ;;  %v489_v22 = vadd.f32 %v488_v19, %v1067_v37  ;;  %v490_v23 = vpop.f32.mrb[43].mxu0 }
 0x1df   :  { %v606_v24 = vmul.f32 %v1081_v43, %v562_v18  ;;  %v491_v25 = vadd.f32 %v490_v23, %v1070_v38  ;;  %639 = vadd.xlane.f32.xlu1 %v638_v20 }
 0x1e0   :  { %v563_v26 = vmax.f32 %v489_v22, 0.0 }
 0x1e1   :  { %v564_v27 = vmax.f32 %v491_v25, 0.0  ;;  %v494_v28 = vpop.f32.mrb[44].mxu0  ;;  %v641_v29 = vadd.f32 %v606_v24, %v605_v21 }
 0x1e2   :  { %v607_v30 = vmul.f32 %v1077_v41, %v563_v26  ;;  %v495_v31 = vadd.f32 %v494_v28, %v1067_v37  ;;  %v496_v32 = vpop.f32.mrb[45].mxu0 }
 0x1e3   :  { %v608_v33 = vmul.f32 %v1081_v43, %v564_v27  ;;  %v497_v34 = vadd.f32 %v496_v32, %v1070_v38  ;;  %642 = vadd.xlane.f32.xlu0 %v641_v29 }
 0x1e4   :  { %v565_v35 = vmax.f32 %v495_v31, 0.0 }
 0x1e5   :  { %v566_v36 = vmax.f32 %v497_v34, 0.0  ;;  %v500_v61 = vpop.f32.mrb[0].mxu1  ;;  %v644_v62 = vadd.f32 %v608_v33, %v607_v30 }
 0x1e6   :  { %v609_v39 = vmul.f32 %v1077_v41, %v565_v35  ;;  %v501_v40 = vadd.f32 %v500_v61, %v1067_v37  ;;  %v502_v42 = vpop.f32.mrb[1].mxu1 }
 0x1e7   :  { %v610_v44 = vmul.f32 %v1081_v43, %v566_v36  ;;  %v503_v45 = vadd.f32 %v502_v42, %v1070_v38  ;;  %645 = vadd.xlane.f32.xlu1 %v644_v62 }
 0x1e8   :  { %v567_v46 = vmax.f32 %v501_v40, 0.0 }
 0x1e9   :  { %v568_v47 = vmax.f32 %v503_v45, 0.0  ;;  %v506_v48 = vpop.f32.mrb[2].mxu1  ;;  %v647_v49 = vadd.f32 %v610_v44, %v609_v39 }
 0x1ea   :  { %v611_v50 = vmul.f32 %v1077_v41, %v567_v46  ;;  %v507_v51 = vadd.f32 %v506_v48, %v1067_v37  ;;  %v508_v52 = vpop.f32.mrb[3].mxu1 }
 0x1eb   :  { %v612_v58 = vmul.f32 %v1081_v43, %v568_v47  ;;  %v509_v53 = vadd.f32 %v508_v52, %v1070_v38  ;;  %648 = vadd.xlane.f32.xlu0 %v647_v49 }
 0x1ec   :  { %v569_v54 = vmax.f32 %v507_v51, 0.0 }
 0x1ed   :  { %v570_v55 = vmax.f32 %v509_v53, 0.0  ;;  %v512_v60 = vpop.f32.mrb[4].mxu1  ;;  %v650_v1 = vadd.f32 %v612_v58, %v611_v50 }
 0x1ee   :  { %v613_v56 = vmul.f32 %v1077_v41, %v569_v54  ;;  %v513_v57 = vadd.f32 %v512_v60, %v1067_v37  ;;  %v514_v59 = vpop.f32.mrb[5].mxu1 }
 0x1ef   :  { %v614_v63 = vmul.f32 %v1081_v43, %v570_v55  ;;  %v515_v0 = vadd.f32 %v514_v59, %v1070_v38  ;;  %651 = vadd.xlane.f32.xlu1 %v650_v1 }
 0x1f0   :  { %v571_v2 = vmax.f32 %v513_v57, 0.0 }
 0x1f1   :  { %v572_v3 = vmax.f32 %v515_v0, 0.0  ;;  %v518_v4 = vpop.f32.mrb[6].mxu1  ;;  %v653_v5 = vadd.f32 %v614_v63, %v613_v56 }
 0x1f2   :  { %v615_v6 = vmul.f32 %v1077_v41, %v571_v2  ;;  %v519_v7 = vadd.f32 %v518_v4, %v1067_v37  ;;  %v520_v8 = vpop.f32.mrb[7].mxu1  ;;  %v738_v2 = vld [vmem:[#allocation2] ss:$0 sm:$0xff] }
 0x1f3   :  { %v616_v9 = vmul.f32 %v1081_v43, %v572_v3  ;;  %v521_v10 = vadd.f32 %v520_v8, %v1070_v38  ;;  %654 = vadd.xlane.f32.xlu0 %v653_v5 }
 0x1f4   :  { %v573_v11 = vmax.f32 %v519_v7, 0.0 }
 0x1f5   :  { %v574_v12 = vmax.f32 %v521_v10, 0.0  ;;  %v524_v13 = vpop.f32.mrb[8].mxu1  ;;  %v656_v14 = vadd.f32 %v616_v9, %v615_v6 }
 0x1f6   :  { %v617_v15 = vmul.f32 %v1077_v41, %v573_v11  ;;  %v525_v16 = vadd.f32 %v524_v13, %v1067_v37  ;;  %v526_v17 = vpop.f32.mrb[9].mxu1 }
 0x1f7   :  { %v618_v18 = vmul.f32 %v1081_v43, %v574_v12  ;;  %v527_v19 = vadd.f32 %v526_v17, %v1070_v38  ;;  %657 = vadd.xlane.f32.xlu1 %v656_v14 }
 0x1f8   :  { %v575_v20 = vmax.f32 %v525_v16, 0.0 }
 0x1f9   :  { %v576_v21 = vmax.f32 %v527_v19, 0.0  ;;  %v530_v22 = vpop.f32.mrb[10].mxu1  ;;  %v659_v23 = vadd.f32 %v618_v18, %v617_v15 }
 0x1fa   :  { %v619_v24 = vmul.f32 %v1077_v41, %v575_v20  ;;  %v531_v25 = vadd.f32 %v530_v22, %v1067_v37  ;;  %v532_v26 = vpop.f32.mrb[11].mxu1 }
 0x1fb   :  { %v620_v27 = vmul.f32 %v1081_v43, %v576_v21  ;;  %v533_v28 = vadd.f32 %v532_v26, %v1070_v38  ;;  %660 = vadd.xlane.f32.xlu0 %v659_v23 }
 0x1fc   :  { %v577_v29 = vmax.f32 %v531_v25, 0.0 }
 0x1fd   :  { %v578_v30 = vmax.f32 %v533_v28, 0.0  ;;  %v536_v31 = vpop.f32.mrb[12].mxu1  ;;  %v662_v32 = vadd.f32 %v620_v27, %v619_v24 }
 0x1fe   :  { %v621_v33 = vmul.f32 %v1077_v41, %v577_v29  ;;  %v537_v34 = vadd.f32 %v536_v31, %v1067_v37  ;;  %v538_v35 = vpop.f32.mrb[13].mxu1 }
 0x1ff   :  { %v622_v36 = vmul.f32 %v1081_v43, %v578_v30  ;;  %v539_v61 = vadd.f32 %v538_v35, %v1070_v38  ;;  %663 = vadd.xlane.f32.xlu1 %v662_v32 }
 0x200   :  { %v579_v62 = vmax.f32 %v537_v34, 0.0 }
 0x201   :  { %v580_v39 = vmax.f32 %v539_v61, 0.0  ;;  %v542_v40 = vpop.f32.mrb[14].mxu1  ;;  %v665_v42 = vadd.f32 %v622_v36, %v621_v33 }
 0x202   :  { %v623_v44 = vmul.f32 %v1077_v41, %v579_v62  ;;  %v543_v45 = vadd.f32 %v542_v40, %v1067_v37  ;;  %v544_v46 = vpop.f32.mrb[15].mxu1 }
 0x203   :  { %v624_v47 = vmul.f32 %v1081_v43, %v580_v39  ;;  %v545_v48 = vadd.f32 %v544_v46, %v1070_v38  ;;  %666 = vadd.xlane.f32.xlu0 %v665_v42 }
 0x204   :  { %v581_v49 = vmax.f32 %v543_v45, 0.0 }
 0x205   :  { %v582_v50 = vmax.f32 %v545_v48, 0.0  ;;  %v548_v51 = vpop.f32.mrb[16].mxu1  ;;  %v668_v52 = vadd.f32 %v624_v47, %v623_v44 }
 0x206   :  { %v625_v58 = vmul.f32 %v1077_v41, %v581_v49  ;;  %v549_v53 = vadd.f32 %v548_v51, %v1067_v37  ;;  %v550_v54 = vpop.f32.mrb[17].mxu1 }
 0x207   :  { %v626_v55 = vmul.f32 %v1081_v43, %v582_v50  ;;  %v551_v60 = vadd.f32 %v550_v54, %v1070_v38  ;;  %669 = vadd.xlane.f32.xlu1 %v668_v52 }
 0x208   :  { %v583_v1 = vmax.f32 %v549_v53, 0.0 }
 0x209   :  { %v584_v56 = vmax.f32 %v551_v60, 0.0  ;;  %v671_v57 = vadd.f32 %v626_v55, %v625_v58 }
 0x20a   :  { %v627_v59 = vmul.f32 %v1077_v41, %v583_v1 }
 0x20b   :  { %v628_v63 = vmul.f32 %v1081_v43, %v584_v56  ;;  %672 = vadd.xlane.f32.xlu0 %v671_v57 }
 0x20d   :  { %v674_v0 = vadd.f32 %v628_v63, %v627_v59 }
 0x20f   :  { %675 = vadd.xlane.f32.xlu1 %v674_v0 }
 0x260   :  { %v631_v3 = vpop.xlane.xlu0 %630 }
 0x261   :  { %v684_v37 = vadd.f32 %v738_v2, %v631_v3 }
 0x263   :  { %701 = vst.msk [vmem:[%s1216_s7] sm:$0xff] %vm700_vm1, %v684_v37 }
 0x264   :  { %v634_v38 = vpop.xlane.xlu0 %633 }
 0x265   :  { %v685_v4 = vadd.f32 %v738_v2, %v634_v38 }
 0x267   :  { %702 = vst.msk [vmem:[%s1216_s7 + $0x8] sm:$0xff] %vm700_vm1, %v685_v4 }
 0x268   :  { %v637_v41 = vpop.xlane.xlu1 %636 }
 0x269   :  { %v686_v43 = vadd.f32 %v738_v2, %v637_v41 }
 0x26b   :  { %703 = vst.msk [vmem:[%s1216_s7 + $0x10] sm:$0xff] %vm700_vm1, %v686_v43 }
 0x26c   :  { %v640_v5 = vpop.xlane.xlu1 %639 }
 0x26d   :  { %v687_v6 = vadd.f32 %v738_v2, %v640_v5 }
 0x26f   :  { %704 = vst.msk [vmem:[%s1216_s7 + $0x18] sm:$0xff] %vm700_vm1, %v687_v6 }
 0x270   :  { %v643_v7 = vpop.xlane.xlu0 %642 }
 0x271   :  { %v688_v8 = vadd.f32 %v738_v2, %v643_v7 }
 0x273   :  { %705 = vst.msk [vmem:[%s1216_s7 + $0x20] sm:$0xff] %vm700_vm1, %v688_v8 }
 0x274   :  { %v646_v9 = vpop.xlane.xlu1 %645 }
 0x275   :  { %v689_v10 = vadd.f32 %v738_v2, %v646_v9 }
 0x277   :  { %706 = vst.msk [vmem:[%s1216_s7 + $0x28] sm:$0xff] %vm700_vm1, %v689_v10 }
 0x278   :  { %v649_v11 = vpop.xlane.xlu0 %648 }
 0x279   :  { %v690_v12 = vadd.f32 %v738_v2, %v649_v11 }
 0x27b   :  { %707 = vst.msk [vmem:[%s1216_s7 + $0x30] sm:$0xff] %vm700_vm1, %v690_v12 }
 0x27c   :  { %v652_v13 = vpop.xlane.xlu1 %651 }
 0x27d   :  { %v691_v14 = vadd.f32 %v738_v2, %v652_v13 }
 0x27f   :  { %708 = vst.msk [vmem:[%s1216_s7 + $0x38] sm:$0xff] %vm700_vm1, %v691_v14 }
 0x280   :  { %v655_v15 = vpop.xlane.xlu0 %654 }
 0x281   :  { %v692_v16 = vadd.f32 %v738_v2, %v655_v15 }
 0x283   :  { %709 = vst.msk [vmem:[%s1216_s7 + $0x40] sm:$0xff] %vm700_vm1, %v692_v16 }
 0x284   :  { %v658_v17 = vpop.xlane.xlu1 %657 }
 0x285   :  { %v693_v18 = vadd.f32 %v738_v2, %v658_v17 }
 0x287   :  { %710 = vst.msk [vmem:[%s1216_s7 + $0x48] sm:$0xff] %vm700_vm1, %v693_v18 }
 0x288   :  { %v661_v19 = vpop.xlane.xlu0 %660 }
 0x289   :  { %v694_v20 = vadd.f32 %v738_v2, %v661_v19 }
 0x28b   :  { %711 = vst.msk [vmem:[%s1216_s7 + $0x50] sm:$0xff] %vm700_vm1, %v694_v20 }
 0x28c   :  { %v664_v21 = vpop.xlane.xlu1 %663 }
 0x28d   :  { %v695_v22 = vadd.f32 %v738_v2, %v664_v21 }
 0x28f   :  { %712 = vst.msk [vmem:[%s1216_s7 + $0x58] sm:$0xff] %vm700_vm1, %v695_v22 }
 0x290   :  { %v667_v23 = vpop.xlane.xlu0 %666 }
 0x291   :  { %v696_v24 = vadd.f32 %v738_v2, %v667_v23 }
 0x293   :  { %713 = vst.msk [vmem:[%s1216_s7 + $0x60] sm:$0xff] %vm700_vm1, %v696_v24 }
 0x294   :  { %v670_v25 = vpop.xlane.xlu1 %669 }
 0x295   :  { %v697_v26 = vadd.f32 %v738_v2, %v670_v25 }
 0x297   :  { %714 = vst.msk [vmem:[%s1216_s7 + $0x68] sm:$0xff] %vm700_vm1, %v697_v26 }
 0x298   :  { %v673_v27 = vpop.xlane.xlu0 %672 }
 0x299   :  { %v698_v28 = vadd.f32 %v738_v2, %v673_v27 }
 0x29b   :  { %715 = vst.msk [vmem:[%s1216_s7 + $0x70] sm:$0xff] %vm700_vm1, %v698_v28 }
 0x29c   :  { %v676_v29 = vpop.xlane.xlu1 %675 }
 0x29d   :  { %v699_v30 = vadd.f32 %v738_v2, %v676_v29 }
 0x29f   :  { %716 = vst.msk [vmem:[%s1216_s7 + $0x78] sm:$0xff] %vm700_vm1, %v699_v30 }
 0x2a0   :  { %721 = vsyncpa [#allocation4], 1 }

</bundles_post_ra>
